<compile_context>
chip_gen: v7x
topology: tpu7x:2x2x1
jax: 0.10.0
libtpu: 0.0.40
codegen_flags: <defaults>
</compile_context>

<pallas_src>
import functools

import jax
import jax.numpy as jnp
from jax import lax
from jax.experimental import pallas as pl
from jax.experimental.pallas import tpu as pltpu


def _nearest_idx_kernel(x_ref, w_ref, w2h_ref, idx_ref, min_sc, arg_sc):
    """One (N-tile, K-tile) grid step of the online nearest-codebook argmin."""
    j = pl.program_id(1)
    tk = w_ref.shape[0]  # static K-tile size

    @pl.when(j == 0)
    def _():
        min_sc[...] = jnp.full_like(min_sc, jnp.inf)
        arg_sc[...] = jnp.zeros_like(arg_sc)

    # bf16 x bf16 -> f32 MXU contraction over the embedding dim (no transpose).
    xw = lax.dot_general(x_ref[...], w_ref[...],
                         dimension_numbers=(((1,), (1,)), ((), ())),
                         preferred_element_type=jnp.float32)     # (TN, TK) f32

    # Relative half squared distance: 0.5*||w||^2 - x.w  (same argmin ordering).
    d = w2h_ref[...] - xw                                        # (TN, TK) f32

    # Per-tile first-minimum argmin; iota kept as a (1, TK) row, broadcast on VPU.
    tile_min = jnp.min(d, axis=1, keepdims=True)                 # (TN, 1)
    col = lax.broadcasted_iota(jnp.int32, (1, tk), 1)            # (1, TK)
    tile_arg = jnp.min(jnp.where(d == tile_min, col, tk),
                       axis=1, keepdims=True) + j * tk           # (TN, 1) global idx

    # Online update: strict '<' keeps the earliest (lowest-index) minimum on ties.
    better = tile_min < min_sc[...]
    arg_sc[...] = jnp.where(better, tile_arg, arg_sc[...])
    min_sc[...] = jnp.where(better, tile_min, min_sc[...])

    @pl.when(j == pl.num_programs(1) - 1)
    def _():
        idx_ref[...] = arg_sc[...]


def _round_up(x, m):
    return ((x + m - 1) // m) * m


@functools.partial(jax.jit, static_argnames=("eps", "block_n", "block_k"))
def nearest_embedding_forward(x, weight, gamma, beta,
                              eps=1e-5, block_n=1024, block_k=256):
    """x: (N, D), weight: (K, D), gamma/beta: (D,)  ->  (N, D) nearest codebook rows."""
    x = x.astype(jnp.float32)
    weight_f32 = weight.astype(jnp.float32)
    n, d = x.shape
    k, d2 = weight_f32.shape
    assert d == d2

    # --- BatchNorm1d (training-mode, biased var) fully hoisted out of the kernel.
    mean = jnp.mean(x, axis=0)
    var = jnp.var(x, axis=0)
    scale = gamma.astype(jnp.float32) * lax.rsqrt(var + eps)
    shift = beta.astype(jnp.float32) - mean * scale
    xn = x * scale[None, :] + shift[None, :]                     # (N, D) f32

    # --- half codebook squared norms hoisted out of the kernel (stay f32).
    w2h = 0.5 * jnp.sum(weight_f32 * weight_f32, axis=1)         # (K,)

    # --- tiling (D is NOT padded: block last dim == full array dim) ----------
    np_ = _round_up(n, 16)                       # bf16 sublane-pack friendly
    tn = min(_round_up(block_n, 16), np_)
    np_ = _round_up(np_, tn)
    kp = _round_up(k, 128)
    tk = min(_round_up(block_k, 128), kp)
    kp = _round_up(kp, tk)

    # bf16 MXU operands (f32 accumulation is requested inside the kernel).
    xn_bf = xn.astype(jnp.bfloat16)
    w_bf = weight_f32.astype(jnp.bfloat16)
    x_p = xn_bf if np_ == n else jnp.zeros((np_, d), jnp.bfloat16).at[:n].set(xn_bf)
    w_p = w_bf if kp == k else jnp.zeros((kp, d), jnp.bfloat16).at[:k].set(w_bf)
    # Padded codebook rows get a huge norm so they can never win the argmin.
    w2h_p = jnp.full((1, kp), 1e30, jnp.float32).at[0, :k].set(w2h)

    grid = (np_ // tn, kp // tk)

    cost = pl.CostEstimate(
        flops=2 * np_ * kp * d,
        transcendentals=0,
        bytes_accessed=(np_ * d * 2                  # x (bf16), read once
                        + grid[0] * kp * d * 2       # codebook stream per N-tile
                        + grid[0] * kp * 4           # norms per N-tile
                        + np_ * 4))                  # idx output

    idx = pl.pallas_call(
        _nearest_idx_kernel,
        out_shape=jax.ShapeDtypeStruct((np_, 1), jnp.int32),
        grid_spec=pltpu.PrefetchScalarGridSpec(
            num_scalar_prefetch=0,
            grid=grid,
            in_specs=[
                pl.BlockSpec((tn, d), lambda i, j: (i, 0)),   # x tile (bf16)
                pl.BlockSpec((tk, d), lambda i, j: (j, 0)),   # codebook tile (bf16)
                pl.BlockSpec((1, tk), lambda i, j: (0, j)),   # 0.5*||w||^2 tile (f32)
            ],
            out_specs=pl.BlockSpec((tn, 1), lambda i, j: (i, 0)),
            scratch_shapes=[pltpu.VMEM((tn, 1), jnp.float32),   # running min dist
                            pltpu.VMEM((tn, 1), jnp.int32)],    # running argmin
        ),
        compiler_params=pltpu.CompilerParams(
            dimension_semantics=("parallel", "arbitrary")),
        cost_estimate=cost,
    )(x_p, w_p, w2h_p)

    idx = idx[:n, 0]
    # Exact HBM row gather of the full-precision codebook rows.
    out = jnp.take(weight_f32, idx, axis=0)                      # (N, D)
    return out


if __name__ == "__main__":
    # Small shapes consistent with the module: batch N, embedding_num K, embedding_dim D.
    # block_n / block_k are shrunk so both grid axes (N-tiling + online K argmin)
    # are actually exercised even at these tiny sizes.
    N, K, D = 24, 300, 32

    key = jax.random.PRNGKey(0)
    kx, kw = jax.random.split(key)

    x = jax.random.normal(kx, (N, D), dtype=jnp.float32)
    # reset_parameters: weight ~ N(0, 1); fresh BatchNorm1d: gamma = 1, beta = 0.
    weight = jax.random.normal(kw, (K, D), dtype=jnp.float32)
    gamma = jnp.ones((D,), dtype=jnp.float32)
    beta = jnp.zeros((D,), dtype=jnp.float32)

    out = nearest_embedding_forward(x, weight, gamma, beta, block_n=16, block_k=128)
    out = jax.block_until_ready(out)

    # Reference matching the kernel numerics: BN with training-mode batch stats in f32,
    # distance matmul with bf16 operands and f32 accumulation (as the MXU computes it),
    # argmin over 0.5*||w||^2 - x.w, then gather of the f32 codebook rows.
    xn = (x - x.mean(0)) / jnp.sqrt(x.var(0) + 1e-5)
    xw_ref = jnp.dot(xn.astype(jnp.bfloat16), weight.astype(jnp.bfloat16).T,
                     preferred_element_type=jnp.float32)
    rel = 0.5 * jnp.sum(weight * weight, axis=1)[None, :] - xw_ref
    ref = weight[jnp.argmin(rel, axis=1)]

    assert out.shape == (N, D)
    assert jnp.allclose(out, ref, atol=1e-5), "mismatch vs. pure-JAX reference"

    print("KERNEL_OK")
</pallas_src>

<mosaic_0001>
module attributes {stable_mosaic.version = 11 : i64} {
  func.func @_nearest_idx_kernel(%arg0: i32, %arg1: i32, %arg2: memref<16x32xbf16, #tpu.memory_space<vmem>>, %arg3: memref<128x32xbf16, #tpu.memory_space<vmem>>, %arg4: memref<1x128xf32, #tpu.memory_space<vmem>>, %arg5: memref<16x1xi32, #tpu.memory_space<vmem>>, %arg6: memref<16x1xf32, #tpu.memory_space<vmem>>, %arg7: memref<16x1xi32, #tpu.memory_space<vmem>>) attributes {dimension_semantics = [#tpu.dimension_semantics<parallel>, #tpu.dimension_semantics<arbitrary>], iteration_bounds = array<i64: 2, 3>, scalar_prefetch = 0 : i64, scratch_operands = 2 : i64, tpu.core_type = #tpu.core_type<tc>, window_params = [{transform_indices = @transform_0, window_bounds = array<i64: 16, 32>}, {transform_indices = @transform_1, window_bounds = array<i64: 128, 32>}, {transform_indices = @transform_2, window_bounds = array<i64: 1, 128>}, {transform_indices = @transform_3, window_bounds = array<i64: 16, 1>}]} {
    %c0_i32 = arith.constant 0 : i32
    %0 = arith.cmpi eq, %arg1, %c0_i32 : i32
    %1 = arith.extui %0 : i1 to i32
    %c0_i32_0 = arith.constant 0 : i32
    %2 = arith.cmpi ne, %1, %c0_i32_0 : i32
    scf.if %2 {
      %cst_20 = arith.constant 0x7F800000 : f32
      %34 = vector.broadcast %cst_20 : f32 to vector<16x1xf32>
      %c0_21 = arith.constant 0 : index
      %c0_22 = arith.constant 0 : index
      %35 = vector.load %arg6[%c0_21, %c0_22] : memref<16x1xf32, #tpu.memory_space<vmem>>, vector<16x1xf32>
      tpu.vector_store %arg6[%c0_21, %c0_22], %34 {strides = array<i32>} : memref<16x1xf32, #tpu.memory_space<vmem>>, vector<16x1xf32>,
      %c0_i32_23 = arith.constant 0 : i32
      %36 = vector.broadcast %c0_i32_23 : i32 to vector<16x1xi32>
      %c0_24 = arith.constant 0 : index
      %c0_25 = arith.constant 0 : index
      %37 = vector.load %arg7[%c0_24, %c0_25] : memref<16x1xi32, #tpu.memory_space<vmem>>, vector<16x1xi32>
      tpu.vector_store %arg7[%c0_24, %c0_25], %36 {strides = array<i32>} : memref<16x1xi32, #tpu.memory_space<vmem>>, vector<16x1xi32>,
    } else {
    }
    %c0 = arith.constant 0 : index
    %c0_1 = arith.constant 0 : index
    %3 = vector.load %arg2[%c0, %c0_1] : memref<16x32xbf16, #tpu.memory_space<vmem>>, vector<16x32xbf16>
    %c0_2 = arith.constant 0 : index
    %c0_3 = arith.constant 0 : index
    %4 = vector.load %arg3[%c0_2, %c0_3] : memref<128x32xbf16, #tpu.memory_space<vmem>>, vector<128x32xbf16>
    %cst = arith.constant dense<0.000000e+00> : vector<16x128xf32>
    %5 = tpu.matmul %3, %4, %cst {dimension_numbers = #tpu.dot_dimension_numbers<[1], [1], [0], [0], [0, 0, 1, 0], [], []>} : vector<16x32xbf16>, vector<128x32xbf16>, vector<16x128xf32> -> vector<16x128xf32>
    %c0_4 = arith.constant 0 : index
    %c0_5 = arith.constant 0 : index
    %6 = vector.load %arg4[%c0_4, %c0_5] : memref<1x128xf32, #tpu.memory_space<vmem>>, vector<1x128xf32>
    %7 = vector.broadcast %6 : vector<1x128xf32> to vector<16x128xf32>
    %8 = arith.subf %7, %5 : vector<16x128xf32>
    %cst_6 = arith.constant dense<0x7F800000> : vector<16xf32>
    %9 = vector.multi_reduction <minimumf>, %8, %cst_6 [1] : vector<16x128xf32> to vector<16xf32>
    %10 = vector.shape_cast %9 : vector<16xf32> to vector<16x1xf32>
    %11 = tpu.iota {dimensions = array<i32: 1>} : vector<1x128xi32>
    %12 = vector.broadcast %10 : vector<16x1xf32> to vector<16x128xf32>
    %13 = arith.cmpf oeq, %8, %12 : vector<16x128xf32>
    %c128_i32 = arith.constant 128 : i32
    %14 = vector.shape_cast %11 : vector<1x128xi32> to vector<1x128xi32>
    %15 = vector.broadcast %14 : vector<1x128xi32> to vector<16x128xi32>
    %16 = vector.broadcast %c128_i32 : i32 to vector<16x128xi32>
    %17 = arith.select %13, %15, %16 : vector<16x128xi1>, vector<16x128xi32>
    %cst_7 = arith.constant dense<2147483647> : vector<16xi32>
    %18 = vector.multi_reduction <minsi>, %17, %cst_7 [1] : vector<16x128xi32> to vector<16xi32>
    %19 = vector.shape_cast %18 : vector<16xi32> to vector<16x1xi32>
    %c128_i32_8 = arith.constant 128 : i32
    %20 = arith.muli %arg1, %c128_i32_8 : i32
    %21 = vector.broadcast %20 : i32 to vector<16x1xi32>
    %22 = arith.addi %19, %21 : vector<16x1xi32>
    %c0_9 = arith.constant 0 : index
    %c0_10 = arith.constant 0 : index
    %23 = vector.load %arg6[%c0_9, %c0_10] : memref<16x1xf32, #tpu.memory_space<vmem>>, vector<16x1xf32>
    %24 = arith.cmpf olt, %10, %23 : vector<16x1xf32>
    %c0_11 = arith.constant 0 : index
    %c0_12 = arith.constant 0 : index
    %25 = vector.load %arg7[%c0_11, %c0_12] : memref<16x1xi32, #tpu.memory_space<vmem>>, vector<16x1xi32>
    %26 = arith.select %24, %22, %25 : vector<16x1xi1>, vector<16x1xi32>
    %c0_13 = arith.constant 0 : index
    %c0_14 = arith.constant 0 : index
    %27 = vector.load %arg7[%c0_13, %c0_14] : memref<16x1xi32, #tpu.memory_space<vmem>>, vector<16x1xi32>
    tpu.vector_store %arg7[%c0_13, %c0_14], %26 {strides = array<i32>} : memref<16x1xi32, #tpu.memory_space<vmem>>, vector<16x1xi32>,
    %c0_15 = arith.constant 0 : index
    %c0_16 = arith.constant 0 : index
    %28 = vector.load %arg6[%c0_15, %c0_16] : memref<16x1xf32, #tpu.memory_space<vmem>>, vector<16x1xf32>
    %29 = arith.select %24, %10, %28 : vector<16x1xi1>, vector<16x1xf32>
    %c0_17 = arith.constant 0 : index
    %c0_18 = arith.constant 0 : index
    %30 = vector.load %arg6[%c0_17, %c0_18] : memref<16x1xf32, #tpu.memory_space<vmem>>, vector<16x1xf32>
    tpu.vector_store %arg6[%c0_17, %c0_18], %29 {strides = array<i32>} : memref<16x1xf32, #tpu.memory_space<vmem>>, vector<16x1xf32>,
    %c2_i32 = arith.constant 2 : i32
    %31 = arith.cmpi eq, %arg1, %c2_i32 : i32
    %32 = arith.extui %31 : i1 to i32
    %c0_i32_19 = arith.constant 0 : i32
    %33 = arith.cmpi ne, %32, %c0_i32_19 : i32
    scf.if %33 {
      %c0_20 = arith.constant 0 : index
      %c0_21 = arith.constant 0 : index
      %34 = vector.load %arg7[%c0_20, %c0_21] : memref<16x1xi32, #tpu.memory_space<vmem>>, vector<16x1xi32>
      %c0_22 = arith.constant 0 : index
      %c0_23 = arith.constant 0 : index
      %35 = vector.load %arg5[%c0_22, %c0_23] : memref<16x1xi32, #tpu.memory_space<vmem>>, vector<16x1xi32>
      tpu.vector_store %arg5[%c0_22, %c0_23], %34 {strides = array<i32>} : memref<16x1xi32, #tpu.memory_space<vmem>>, vector<16x1xi32>,
    } else {
    }
    return
  }
  func.func @transform_0(%arg0: i32, %arg1: i32) -> (i32, i32) {
    %c0_i32 = arith.constant 0 : i32
    %c0_i32_0 = arith.constant 0 : i32
    return %arg0, %c0_i32 : i32, i32
  }
  func.func @transform_1(%arg0: i32, %arg1: i32) -> (i32, i32) {
    %c0_i32 = arith.constant 0 : i32
    %c0_i32_0 = arith.constant 0 : i32
    return %arg1, %c0_i32 : i32, i32
  }
  func.func @transform_2(%arg0: i32, %arg1: i32) -> (i32, i32) {
    %c0_i32 = arith.constant 0 : i32
    %c0_i32_0 = arith.constant 0 : i32
    return %c0_i32, %arg1 : i32, i32
  }
  func.func @transform_3(%arg0: i32, %arg1: i32) -> (i32, i32) {
    %c0_i32 = arith.constant 0 : i32
    %c0_i32_0 = arith.constant 0 : i32
    return %arg0, %c0_i32 : i32, i32
  }
}

</mosaic_0001>

<bundles_post_ra>
// kernel: nearest_embedding_forward.1
= control target key start
LH: loop header
LB: loop body
LE: loop exit
PB: predicated region body
PF: predicated region fallthrough
CT: control target
= control target key end

     0   :  { %s702_s12 = smov 0   ;;  %s704_s13 = smov 0   ;;  %s811_s0 = inlined_call_operand.vmem [shape: bf16[32,32], index: 0, kind: input, shape index: {}]   ;;  %s812_s1 = inlined_call_operand.vmem [shape: bf16[384,32], index: 1, kind: input, shape index: {}]   ;;  %s813_s2 = inlined_call_operand.vmem [shape: f32[1,384], index: 2, kind: input, shape index: {}]   ;;  %s814_s3 = inlined_call_operand.vmem [shape: s32[32,1], index: 3, kind: output, shape index: {}]  }
   0x1   :  { %s706_s14 = smov 0   ;;  %s708_s15 = smov 0  }
   0x2   :  { %s710_s16 = smov 0  }
   0x3 LB: > { %s22_s17 = sadd.s32 1, %s668_s14  ;;  %s25_s18 = sadd.s32 1, %s672_s15  ;;  %s676_s16 = sphi %s710_s16, %s13_s16   ;;  %s672_s15 = sphi %s708_s15, %s818_s15   ;;  %s668_s14 = sphi %s706_s14, %s817_s14   ;;  %s664_s13 = sphi %s704_s13, %s816_s13   ;;  %s660_s12 = sphi %s702_s12, %s815_s12  }
   0x4   : > { %p23_p0 = scmp.ge.s32.totalorder %s22_s17, 3  ;;  %p533_p1 = scmp.ge.s32.totalorder %s676_s16, 1 }
   0x5   : > { %p169_p2 = scmp.lt.s32.totalorder %s676_s16, 7 }
   0x6   : > { %s820_s17 = smov (%p23_p0, %s22_s17), 0  ;;  %s822_s18 = smov (!%p23_p0, %s25_s18), %s672_s15 }
   0x7   : > { %p170_p3 = pnand %p533_p1, %p169_p2  ;;  %p27_p4 = scmp.ge.s32.totalorder %s822_s18, 2 }
   0x8   : > { %s534_s19 = sshll.u32 (!%p170_p3), %s664_s13, 1  ;;  %s536_s20 = sshll.u32 (!%p170_p3), %s660_s12, 4 }
   0x9   : > { %s824_s18 = smov (%p27_p4, %s822_s18), 0  ;;  %173 = sbr.rel (%p170_p3) target bundleno = 761 (0x2f9), region = 32 }
   0xa   : > { %p202_p5 = scmp.lt.s32.totalorder (!%p170_p3), %s534_s19, 3  ;;  %p208_p6 = scmp.lt.s32.totalorder (!%p170_p3), %s536_s20, 47 }
   0xb   : > { %p213_p7 = scmp.lt.s32.totalorder (!%p170_p3), %s660_s12, 2  ;;  %p540_p8 = scmp.ne.s32.totalorder (!%p170_p3), %s660_s12, 0 }
  0x10   : > { %s826_s19 = smov (!%p202_p5, %s534_s19), 3  ;;  %s828_s20 = smov (!%p208_p6, %s536_s20), 47 }
  0x11   : > { %s535_s21 = sshll.u32 %s826_s19, 2  ;;  %s539_s22 = sshll.u32 %s826_s19, 3  ;;  %vm227_vm0 = vcmask (!%p540_p8), 7168   ;;  %v678_v0 = vmov (!%p540_p8), inf   ;;  %v679_v1 = vmov (!%p540_p8), 0  }
  0x12   : > { %s739_s25 = scalar_lea.vmem %s811_s0, %s535_s21  ;;  %s537_s26 = sshll.u32 %s828_s20, 2  ;;  %228 = vst.msk [vmem:[#allocation2] sm:$0xff] (!%p540_p8), %vm227_vm0, %v678_v0  ;;  %229 = vst.msk [vmem:[#allocation2 + $0x8] sm:$0xff] (!%p540_p8), %vm227_vm0, %v678_v0 }
  0x13   : > { %s744_s29 = scalar_lea.vmem %s812_s1, %s537_s26  ;;  %s749_s5 = scalar_lea.vmem %s814_s3, %s539_s22  ;;  %230 = vst.msk [vmem:[#allocation3] sm:$0xff] (!%p540_p8), %vm227_vm0, %v679_v1  ;;  %231 = vst.msk [vmem:[#allocation3 + $0x8] sm:$0xff] (!%p540_p8), %vm227_vm0, %v679_v1 }
  0x14   : > { %s752_s6 = scalar_select %p213_p7, %s660_s12, 2 }
  0x15   : > { %226 = sbr.rel (%p540_p8) target bundleno = 28 (0x1c), region = 36 }
  0x16   : > { %s215_s9 = scalar_lea.vmem %s813_s2, %s752_s6 }
  0x1c PF: > { %v629_v2 = vld [vmem:[%s744_s29] sm:$0xff]   ;;  %v680_v3 = vmov 0.0   ;;  %vm295_vm1 = vcmask 261120   ;;  %v630_v5 = vld [vmem:[%s744_s29 + $0x8] sm:$0xff]   ;;  %vm681_vm2 = vmmov 0   ;;  %v631_v7 = vld [vmem:[%s744_s29 + $0x10] sm:$0xff]   ;;  %v377_v27 = vlaneseq }
  0x1d   : > { %565 = vmatprep.subr.bf16.mxu0 %v680_v3  ;;  %v300_v4 = vsel %vm295_vm1, %v629_v2, 0  ;;  %v303_v6 = vsel %vm295_vm1, %v630_v5, 0  ;;  %581 = vmatprep.mubr.msk.bf16.mxu0 %vm681_vm2, %v680_v3  ;;  %v306_v8 = vsel %vm295_vm1, %v631_v7, 0  ;;  %v632_v9 = vld [vmem:[%s744_s29 + $0x18] sm:$0xff]   ;;  %v633_v11 = vld [vmem:[%s744_s29 + $0x20] sm:$0xff]   ;;  %v634_v13 = vld [vmem:[%s744_s29 + $0x28] sm:$0xff]  }
  0x1e   : > { %566 = vmatpush3.bf16.xpose.msra.mxu0 %v300_v4  ;;  %v309_v10 = vsel %vm295_vm1, %v632_v9, 0  ;;  %v312_v12 = vsel %vm295_vm1, %v633_v11, 0  ;;  %v315_v14 = vsel %vm295_vm1, %v634_v13, 0  ;;  %v635_v15 = vld [vmem:[%s744_s29 + $0x30] sm:$0xff]   ;;  %v636_v17 = vld [vmem:[%s744_s29 + $0x38] sm:$0xff]   ;;  %v637_v19 = vld [vmem:[%s739_s25] sm:$0xff]  }
  0x1f   : > { %567 = vmatprep.subr.bf16.mxu0 %v680_v3  ;;  %v318_v16 = vsel %vm295_vm1, %v635_v15, 0  ;;  %v321_v18 = vsel %vm295_vm1, %v636_v17, 0  ;;  %v551_v20 = vld [vmem:[%s215_s9] ss:$0 sm:$0xff]  ;;  %v378_v29 = vand.u32 127, %v377_v27  ;;  %vm423_vm3 = vcmask 7168  }
  0x20   : > { %v415_v28 = vld [vmem:[#allocation2] sm:$0xff]  ;;  %v416_v32 = vld [vmem:[#allocation2 + $0x8] sm:$0xff]  ;;  %s552_s13 = sshll.u32 %s660_s12, 7  ;;  %v419_v56 = vld [vmem:[#allocation3] sm:$0xff]  ;;  %p553_p9 = scmp.ne.s32.totalorder %s660_s12, 2 }
  0x21   : > { %v412_v54 = vstv %s552_s13  ;;  %v420_v63 = vld [vmem:[#allocation3 + $0x8] sm:$0xff] }
  0x26   : > { %568 = vmatpush3.bf16.xpose.msra.mxu0 %v303_v6 }
  0x27   : > { %569 = vmatprep.subr.bf16.mxu0 %v680_v3 }
  0x2e   : > { %570 = vmatpush3.bf16.xpose.msra.mxu0 %v306_v8 }
  0x2f   : > { %571 = vmatprep.subr.bf16.mxu0 %v680_v3 }
  0x36   : > { %572 = vmatpush3.bf16.xpose.msra.mxu0 %v309_v10 }
  0x37   : > { %573 = vmatprep.subr.bf16.mxu0 %v680_v3 }
  0x3e   : > { %574 = vmatpush3.bf16.xpose.msra.mxu0 %v312_v12 }
  0x3f   : > { %575 = vmatprep.subr.bf16.mxu0 %v680_v3 }
  0x46   : > { %576 = vmatpush3.bf16.xpose.msra.mxu0 %v315_v14 }
  0x47   : > { %577 = vmatprep.subr.bf16.mxu0 %v680_v3 }
  0x4e   : > { %578 = vmatpush3.bf16.xpose.msra.mxu0 %v318_v16 }
  0x4f   : > { %579 = vmatprep.subr.bf16.mxu0 %v680_v3 }
  0x56   : > { %580 = vmatpush3.bf16.xpose.msra.mxu0 %v321_v18 }
  0x5d   : > { %582 = vmatmul.mubr.msk.bf16.vlgmr.msra.gmra.mrb[0].mxu0 %vm295_vm1, %v637_v19 }
 0x130   : > { %v357_v21 = vpop.f32.mrb[0].mxu0 }
 0x131   : > { %v371_v22 = vsub.f32 %v551_v20, %v357_v21  ;;  %v583_v23 = vpop.f32.mrb[1].mxu0 }
 0x132   : > { %v360_v24 = vpop.f32.mrb[2].mxu0 }
 0x133   : > { %373 = vmin.xlane.f32.xlu0 %v371_v22  ;;  %v584_v25 = vpop.f32.mrb[3].mxu0  ;;  %v372_v26 = vsub.f32 %v551_v20, %v360_v24 }
 0x137   : > { %375 = vmin.xlane.f32.xlu0 %v372_v26 }
 0x1c0   : > { %v374_v30 = vpop.xlane.xlu0 %373 }
 0x1c1   : > { %vm379_vm4 = vcmp.eq.f32.partialorder %v371_v22, %v374_v30  ;;  %vm417_vm5 = vcmp.lt.f32.partialorder %v374_v30, %v415_v28 }
 0x1c2   : > { %v428_v31 = vsel %vm417_vm5, %v374_v30, %v415_v28  ;;  %v381_v33 = vsel %vm379_vm4, %v378_v29, 128 }
 0x1c3   : > { %430 = vst.msk [vmem:[#allocation2] sm:$0xff] %vm423_vm3, %v428_v31  ;;  %v384_v34 = vshra.s32 %v381_v33, 16  ;;  %v383_v41 = vand.u32 65535, %v381_v33 }
 0x1c4   : > { %v376_v35 = vpop.xlane.xlu0 %375 }
 0x1c5   : > { %vm380_vm6 = vcmp.eq.f32.partialorder %v372_v26, %v376_v35  ;;  %vm418_vm7 = vcmp.lt.f32.partialorder %v376_v35, %v416_v32  ;;  %v386_v36 = vcvt.s32.f32 %v384_v34  ;;  %v385_v43 = vcvt.s32.f32 %v383_v41 }
 0x1c6   : > { %v429_v37 = vsel %vm418_vm7, %v376_v35, %v416_v32  ;;  %v382_v38 = vsel %vm380_vm6, %v378_v29, 128 }
 0x1c7   : > { %431 = vst.msk [vmem:[#allocation2 + $0x8] sm:$0xff] %vm423_vm3, %v429_v37  ;;  %387 = vmin.xlane.f32.xlu1 %v386_v36  ;;  %v398_v39 = vshra.s32 %v382_v38, 16  ;;  %v397_v44 = vand.u32 65535, %v382_v38 }
 0x1c9   : > { %v400_v40 = vcvt.s32.f32 %v398_v39  ;;  %v399_v47 = vcvt.s32.f32 %v397_v44 }
 0x1cb   : > { %401 = vmin.xlane.f32.xlu1 %v400_v40 }
 0x254   : > { %v388_v42 = vpop.xlane.xlu1 %387 }
 0x255   : > { %vm389_vm8 = vcmp.eq.f32.partialorder %v386_v36, %v388_v42  ;;  %v394_v49 = vcvt.f32.s32 %v388_v42 }
 0x256   : > { %v390_v45 = vsel %vm389_vm8, %v385_v43, inf }
 0x257   : > { %391 = vmin.xlane.f32.xlu0 %v390_v45  ;;  %v395_v51 = vshll.u32 %v394_v49, 16 }
 0x258   : > { %v402_v46 = vpop.xlane.xlu1 %401 }
 0x259   : > { %vm403_vm9 = vcmp.eq.f32.partialorder %v400_v40, %v402_v46  ;;  %v408_v52 = vcvt.f32.s32 %v402_v46 }
 0x25a   : > { %v404_v48 = vsel %vm403_vm9, %v399_v47, inf }
 0x25b   : > { %405 = vmin.xlane.f32.xlu1 %v404_v48  ;;  %v409_v58 = vshll.u32 %v408_v52, 16 }
 0x2e4   : > { %v392_v50 = vpop.xlane.xlu0 %391 }
 0x2e5   : > { %v393_v53 = vcvt.f32.s32 %v392_v50 }
 0x2e7   : > { %v396_v55 = vadd.s32 %v395_v51, %v393_v53 }
 0x2e8   : > { %v406_v57 = vpop.xlane.xlu1 %405 }
 0x2e9   : > { %v413_v59 = vadd.s32 %v412_v54, %v396_v55  ;;  %v407_v60 = vcvt.f32.s32 %v406_v57 }
 0x2ea   : > { %435 = sbr.rel (%p553_p9) target bundleno = 761 (0x2f9), region = 40 }
 0x2eb   : > { %v421_v61 = vsel %vm417_vm5, %v413_v59, %v419_v56  ;;  %v410_v62 = vadd.s32 %v409_v58, %v407_v60 }
 0x2ec   : > { %424 = vst.msk [vmem:[#allocation3] sm:$0xff] %vm423_vm3, %v421_v61 }
 0x2ed   : > { %v414_v0 = vadd.s32 %v412_v54, %v410_v62 }
 0x2ef   : > { %v422_v1 = vsel %vm418_vm7, %v414_v0, %v420_v63 }
 0x2f0   : > { %425 = vst.msk [vmem:[#allocation3 + $0x8] sm:$0xff] %vm423_vm3, %v422_v1 }
 0x2f3   : > { %v436_v2 = vld [vmem:[#allocation3] sm:$0xff] }
 0x2f4   : > { %438 = vst.msk [vmem:[%s749_s5] sm:$0xff] %vm423_vm3, %v436_v2 }
 0x2f7   : > { %v437_v3 = vld [vmem:[#allocation3 + $0x8] sm:$0xff] }
 0x2f8   : > { %439 = vst.msk [vmem:[%s749_s5 + $0x8] sm:$0xff] %vm423_vm3, %v437_v3 }
 0x2f9 PF: > { %s13_s16 = sadd.s32 1, %s676_s16   ;;  %s815_s12 = smov %s668_s14 }
 0x2fa   : > { %p10_p10 = scmp.ge.s32.totalorder %s13_s16, 8   ;;  %s816_s13 = smov %s672_s15 }
 0x2fb   : > { %s817_s14 = smov %s820_s17  ;;  %s818_s15 = smov %s824_s18 }
 0x2fc   :  { %12 = sbr.rel (!%p10_p10) target bundleno = 3 (0x3), region = 76 }

</bundles_post_ra>
